<compile_context>
chip_gen: v7x
topology: tpu7x:2x2x1
jax: 0.10.0
libtpu: 0.0.40
codegen_flags: <defaults>
</compile_context>

<pallas_src>
import functools

import numpy as np
import jax
import jax.numpy as jnp
from jax import lax
from jax.experimental import pallas as pl
from jax.experimental.pallas import tpu as pltpu

BN_EPS = 1e-5


# ----------------------------- fused kernel ----------------------------------

def _conv_normal_kernel(*refs, H, W, bottleneck):
    """Fused [1x1 conv + BN + ReLU] -> [3x3 conv + BN + ReLU] -> channel concat.

    Per grid step (one batch element), everything stays in VMEM:
      x_ref    : (nIn, HW)           input activations
      w1_ref   : (nInner, nIn)       1x1 conv weights          (bottleneck only)
      s1/b1    : (nInner, 1) f32     folded BN1 scale / shift  (bottleneck only)
      w3_ref   : (9, nOut, nInner)   3x3 conv weights, one (nOut,nInner) per tap
      s3/b3    : (nOut, 1) f32       folded BN3 scale / shift
      mask_ref : (9, HW) f32         per-tap border-validity masks
      o_ref    : (nIn + nOut, HW)    output: [x ; y]
    """
    if bottleneck:
        x_ref, w1_ref, s1_ref, b1_ref, w3_ref, s3_ref, b3_ref, mask_ref, o_ref = refs
    else:
        x_ref, w3_ref, s3_ref, b3_ref, mask_ref, o_ref = refs

    HW = H * W
    x = x_ref[...]                                    # (nIn, HW)
    nIn = x.shape[0]

    # ---- optional bottleneck: 1x1 conv + BN(eval) + ReLU, fused in-VMEM.
    if bottleneck:
        h = jnp.dot(w1_ref[...], x, preferred_element_type=jnp.float32)
        h = jnp.maximum(h * s1_ref[...] + b1_ref[...], 0.0)
        h = h.astype(x.dtype)                         # (nInner, HW)
    else:
        h = x                                         # nInner == nIn

    # ---- 3x3 conv (stride 1, pad 1) + BN + ReLU via 9 in-kernel taps.
    # Zero-pad the lane axis once; each tap is then a single static lane-shift
    # slice (no HBM-expanded im2col tensor, no per-tap concatenation).
    pad = W + 1                                       # max |tap lane offset|
    zeros = jnp.zeros((h.shape[0], pad), h.dtype)
    hp = jnp.concatenate([zeros, h, zeros], axis=1)   # (nInner, HW + 2W + 2)

    w3 = w3_ref[...]                                  # (9, nOut, nInner)
    masks = mask_ref[...]                             # (9, HW) f32
    nOut = w3.shape[1]

    acc = jnp.zeros((nOut, HW), jnp.float32)
    for t in range(9):                                # statically unrolled
        dh, dw = t // 3 - 1, t % 3 - 1
        off = dh * W + dw                             # flattened-HW shift
        shifted = hp[:, pad + off: pad + off + HW]    # shifted[:, p] = h[:, p+off]
        contrib = jnp.dot(w3[t], shifted, preferred_element_type=jnp.float32)
        acc = acc + contrib * masks[t:t + 1, :]       # zero out-of-image taps

    y = jnp.maximum(acc * s3_ref[...] + b3_ref[...], 0.0)

    # ---- write concat([x, y], channel axis) directly: no XLA concat,
    # no extra HBM round trip of x or y.
    o_ref[:nIn, :] = x.astype(o_ref.dtype)
    o_ref[nIn:, :] = y.astype(o_ref.dtype)


# ------------------------------- wrapper --------------------------------------

def _tap_border_masks(H, W):
    """(9, H*W) f32 masks; mask[t, p] == 1 iff tap t reads inside the image."""
    hh, ww = np.meshgrid(np.arange(H), np.arange(W), indexing="ij")
    rows = []
    for dh in (-1, 0, 1):
        for dw in (-1, 0, 1):
            valid = ((hh + dh >= 0) & (hh + dh < H) &
                     (ww + dw >= 0) & (ww + dw < W))
            rows.append(valid.reshape(-1))
    return jnp.asarray(np.stack(rows), dtype=jnp.float32)


def _bn_scale_shift(bn):
    """Inference-mode BN as per-channel (scale, shift), kept in f32."""
    gamma, beta, mean, var = bn
    scale = gamma.astype(jnp.float32) / jnp.sqrt(var.astype(jnp.float32) + BN_EPS)
    shift = beta.astype(jnp.float32) - mean.astype(jnp.float32) * scale
    return scale.reshape(-1, 1), shift.reshape(-1, 1)


def _vmem_limit_bytes(per_step_bytes):
    """Explicit scoped-VMEM limit: what we need, capped at the chip capacity."""
    try:
        cap = int(pltpu.get_tpu_info().vmem_capacity_bytes)
    except Exception:
        cap = 64 * 1024 * 1024          # conservative: v7x per-core VMEM
    want = max(int(per_step_bytes), 32 * 1024 * 1024)
    return int(min(want, int(cap * 0.9)))


def conv_normal_pallas(x_nchw, w1, bn1, w3, bn3, *, bottleneck):
    """ConvNormal forward: concat([x, ConvBN_normal(x)], channel axis)."""
    N, nIn, H, W = x_nchw.shape
    HW = H * W
    nOut, nInner = w3.shape[0], w3.shape[1]
    dt = x_nchw.dtype
    esize = jnp.dtype(dt).itemsize

    x_flat = x_nchw.reshape(N, nIn, HW)               # lane axis = H*W (lane-dense)
    masks = _tap_border_masks(H, W)

    # Per-tap 3x3 weights: tap t = kh*3 + kw -> (nOut, nInner).
    w3_taps = jnp.transpose(w3, (2, 3, 0, 1)).reshape(9, nOut, nInner).astype(dt)
    s3, b3 = _bn_scale_shift(bn3)

    kernel = functools.partial(_conv_normal_kernel, H=H, W=W,
                               bottleneck=bottleneck)

    if bottleneck:
        w1_2d = w1.reshape(nInner, nIn).astype(dt)
        s1, b1 = _bn_scale_shift(bn1)
        inputs = (x_flat, w1_2d, s1, b1, w3_taps, s3, b3, masks)
        in_specs = [
            pl.BlockSpec((None, nIn, HW), lambda n: (n, 0, 0)),    # x (batch squeezed)
            pl.BlockSpec((nInner, nIn), lambda n: (0, 0)),         # 1x1 weights (resident)
            pl.BlockSpec((nInner, 1), lambda n: (0, 0)),           # BN1 scale
            pl.BlockSpec((nInner, 1), lambda n: (0, 0)),           # BN1 shift
            pl.BlockSpec((9, nOut, nInner), lambda n: (0, 0, 0)),  # 3x3 tap weights
            pl.BlockSpec((nOut, 1), lambda n: (0, 0)),             # BN3 scale
            pl.BlockSpec((nOut, 1), lambda n: (0, 0)),             # BN3 shift
            pl.BlockSpec((9, HW), lambda n: (0, 0)),               # border masks
        ]
    else:
        inputs = (x_flat, w3_taps, s3, b3, masks)
        in_specs = [
            pl.BlockSpec((None, nIn, HW), lambda n: (n, 0, 0)),
            pl.BlockSpec((9, nOut, nInner), lambda n: (0, 0, 0)),
            pl.BlockSpec((nOut, 1), lambda n: (0, 0)),
            pl.BlockSpec((nOut, 1), lambda n: (0, 0)),
            pl.BlockSpec((9, HW), lambda n: (0, 0)),
        ]

    # Per-step working set (double-buffered x/out blocks, resident weights and
    # masks, f32 temporaries h / padded-h / acc) -> explicit scoped-VMEM limit.
    per_step = (
        2 * (nIn * HW + (nIn + nOut) * HW) * esize
        + (nInner * nIn + 9 * nOut * nInner) * esize
        + 9 * HW * 4
        + (2 * nInner * (HW + 2 * W + 2) + nOut * HW) * 4
    )
    vmem_limit = _vmem_limit_bytes(int(per_step * 1.5))

    out = pl.pallas_call(
        kernel,
        out_shape=jax.ShapeDtypeStruct((N, nIn + nOut, HW), dt),
        grid_spec=pltpu.PrefetchScalarGridSpec(
            num_scalar_prefetch=0,
            grid=(N,),                                             # one step per image
            in_specs=in_specs,
            out_specs=pl.BlockSpec((None, nIn + nOut, HW), lambda n: (n, 0, 0)),
        ),
        compiler_params=pltpu.CompilerParams(
            dimension_semantics=("parallel",),
            vmem_limit_bytes=vmem_limit),
    )(*inputs)

    return out.reshape(N, nIn + nOut, H, W)            # free reshape to NCHW


# ----------------------------- pure-JAX reference -----------------------------

def _conv_bn_relu_reference(x, w, gamma, beta, mean, var, pad):
    y = lax.conv_general_dilated(
        x.astype(jnp.float32), w.astype(jnp.float32),
        window_strides=(1, 1), padding=[(pad, pad), (pad, pad)],
        dimension_numbers=("NCHW", "OIHW", "NCHW"))
    scale = gamma / jnp.sqrt(var + BN_EPS)
    shift = beta - mean * scale
    y = y * scale[None, :, None, None] + shift[None, :, None, None]
    return jnp.maximum(y, 0.0)


def conv_normal_reference(x, w1, bn1, w3, bn3, *, bottleneck):
    h = x
    if bottleneck:
        h = _conv_bn_relu_reference(h, w1, *bn1, pad=0)
    y = _conv_bn_relu_reference(h, w3, *bn3, pad=1)
    return jnp.concatenate([x, y.astype(x.dtype)], axis=1)


if __name__ == "__main__":
    key = jax.random.PRNGKey(0)
    ks = jax.random.split(key, 11)

    # Small shapes consistent with the module: batch=2, nIn=4, nOut=8, spatial=16.
    N, nIn, nOut, H, W = 2, 4, 8, 16, 16
    bottleneck, bnWidth = True, 1
    nInner = min(nIn, bnWidth * nOut) if bottleneck else nIn

    x = jax.random.normal(ks[0], (N, nIn, H, W), dtype=jnp.float32)

    # Conv weights (OIHW, PyTorch-default-like scaling), no conv bias.
    w1 = jax.random.normal(ks[1], (nInner, nIn, 1, 1), jnp.float32) * (2.0 / nIn) ** 0.5
    w3 = (jax.random.normal(ks[2], (nOut, nInner, 3, 3), jnp.float32)
          * (2.0 / (9 * nInner)) ** 0.5)

    # BatchNorm (eval mode) parameters / running stats; randomized to exercise the fold.
    bn1 = (1.0 + 0.1 * jax.random.normal(ks[3], (nInner,), jnp.float32),
           0.1 * jax.random.normal(ks[4], (nInner,), jnp.float32),
           0.1 * jax.random.normal(ks[5], (nInner,), jnp.float32),
           0.5 + jnp.abs(jax.random.normal(ks[6], (nInner,), jnp.float32)))
    bn3 = (1.0 + 0.1 * jax.random.normal(ks[7], (nOut,), jnp.float32),
           0.1 * jax.random.normal(ks[8], (nOut,), jnp.float32),
           0.1 * jax.random.normal(ks[9], (nOut,), jnp.float32),
           0.5 + jnp.abs(jax.random.normal(ks[10], (nOut,), jnp.float32)))

    out = conv_normal_pallas(x, w1, bn1, w3, bn3, bottleneck=bottleneck)
    out = jax.block_until_ready(out)

    ref = conv_normal_reference(x, w1, bn1, w3, bn3, bottleneck=bottleneck)
    assert out.shape == (N, nIn + nOut, H, W), out.shape
    err = jnp.max(jnp.abs(out - ref))
    assert jnp.allclose(out, ref, atol=1e-3, rtol=1e-3), f"mismatch vs reference: {err}"

    print("KERNEL_OK")
</pallas_src>

<mosaic_0001>
module attributes {stable_mosaic.version = 11 : i64} {
  func.func @_conv_normal_kernel(%arg0: i32, %arg1: memref<1x4x256xf32, #tpu.memory_space<vmem>>, %arg2: memref<4x4xf32, #tpu.memory_space<vmem>>, %arg3: memref<4x1xf32, #tpu.memory_space<vmem>>, %arg4: memref<4x1xf32, #tpu.memory_space<vmem>>, %arg5: memref<9x8x4xf32, #tpu.memory_space<vmem>>, %arg6: memref<8x1xf32, #tpu.memory_space<vmem>>, %arg7: memref<8x1xf32, #tpu.memory_space<vmem>>, %arg8: memref<9x256xf32, #tpu.memory_space<vmem>>, %arg9: memref<1x12x256xf32, #tpu.memory_space<vmem>>) attributes {dimension_semantics = [#tpu.dimension_semantics<parallel>], iteration_bounds = array<i64: 2>, scalar_prefetch = 0 : i64, scratch_operands = 0 : i64, tpu.core_type = #tpu.core_type<tc>, window_params = [{transform_indices = @transform_0, window_bounds = array<i64: 1, 4, 256>}, {pipeline_mode = #tpu.pipeline_mode<synchronous>, transform_indices = @transform_1, window_bounds = array<i64: 4, 4>}, {pipeline_mode = #tpu.pipeline_mode<synchronous>, transform_indices = @transform_2, window_bounds = array<i64: 4, 1>}, {pipeline_mode = #tpu.pipeline_mode<synchronous>, transform_indices = @transform_3, window_bounds = array<i64: 4, 1>}, {pipeline_mode = #tpu.pipeline_mode<synchronous>, transform_indices = @transform_4, window_bounds = array<i64: 9, 8, 4>}, {pipeline_mode = #tpu.pipeline_mode<synchronous>, transform_indices = @transform_5, window_bounds = array<i64: 8, 1>}, {pipeline_mode = #tpu.pipeline_mode<synchronous>, transform_indices = @transform_6, window_bounds = array<i64: 8, 1>}, {pipeline_mode = #tpu.pipeline_mode<synchronous>, transform_indices = @transform_7, window_bounds = array<i64: 9, 256>}, {transform_indices = @transform_8, window_bounds = array<i64: 1, 12, 256>}]} {
    %c0 = arith.constant 0 : index
    %c0_0 = arith.constant 0 : index
    %c0_1 = arith.constant 0 : index
    %0 = vector.load %arg1[%c0, %c0_0, %c0_1] : memref<1x4x256xf32, #tpu.memory_space<vmem>>, vector<1x4x256xf32>
    %1 = vector.shape_cast %0 : vector<1x4x256xf32> to vector<4x256xf32>
    %c0_2 = arith.constant 0 : index
    %c0_3 = arith.constant 0 : index
    %2 = vector.load %arg2[%c0_2, %c0_3] : memref<4x4xf32, #tpu.memory_space<vmem>>, vector<4x4xf32>
    %cst = arith.constant dense<0.000000e+00> : vector<4x256xf32>
    %3 = tpu.matmul %2, %1, %cst {dimension_numbers = #tpu.dot_dimension_numbers<[1], [0], [0], [1], [0, 0, 1, 1], [], []>} : vector<4x4xf32>, vector<4x256xf32>, vector<4x256xf32> -> vector<4x256xf32>
    %c0_4 = arith.constant 0 : index
    %c0_5 = arith.constant 0 : index
    %4 = vector.load %arg3[%c0_4, %c0_5] : memref<4x1xf32, #tpu.memory_space<vmem>>, vector<4x1xf32>
    %5 = vector.broadcast %4 : vector<4x1xf32> to vector<4x256xf32>
    %6 = arith.mulf %3, %5 : vector<4x256xf32>
    %c0_6 = arith.constant 0 : index
    %c0_7 = arith.constant 0 : index
    %7 = vector.load %arg4[%c0_6, %c0_7] : memref<4x1xf32, #tpu.memory_space<vmem>>, vector<4x1xf32>
    %8 = vector.broadcast %7 : vector<4x1xf32> to vector<4x256xf32>
    %9 = arith.addf %6, %8 : vector<4x256xf32>
    %cst_8 = arith.constant 0.000000e+00 : f32
    %10 = vector.broadcast %cst_8 : f32 to vector<4x256xf32>
    %11 = arith.maximumf %9, %10 : vector<4x256xf32>
    %cst_9 = arith.constant 0.000000e+00 : f32
    %12 = vector.broadcast %cst_9 : f32 to vector<4x17xf32>
    %13 = tpu.concatenate %12, %11, %12 in 1 : vector<4x17xf32>, vector<4x256xf32>, vector<4x17xf32> -> vector<4x290xf32>
    %c0_10 = arith.constant 0 : index
    %c0_11 = arith.constant 0 : index
    %c0_12 = arith.constant 0 : index
    %14 = vector.load %arg5[%c0_10, %c0_11, %c0_12] : memref<9x8x4xf32, #tpu.memory_space<vmem>>, vector<9x8x4xf32>
    %c0_13 = arith.constant 0 : index
    %c0_14 = arith.constant 0 : index
    %15 = vector.load %arg8[%c0_13, %c0_14] : memref<9x256xf32, #tpu.memory_space<vmem>>, vector<9x256xf32>
    %cst_15 = arith.constant 0.000000e+00 : f32
    %16 = vector.broadcast %cst_15 : f32 to vector<8x256xf32>
    %17 = vector.extract_strided_slice %13 {offsets = [0, 0], sizes = [4, 256], strides = [1, 1]} : vector<4x290xf32> to vector<4x256xf32>
    %18 = vector.extract_strided_slice %14 {offsets = [0, 0, 0], sizes = [1, 8, 4], strides = [1, 1, 1]} : vector<9x8x4xf32> to vector<1x8x4xf32>
    %19 = vector.shape_cast %18 : vector<1x8x4xf32> to vector<8x4xf32>
    %cst_16 = arith.constant dense<0.000000e+00> : vector<8x256xf32>
    %20 = tpu.matmul %19, %17, %cst_16 {dimension_numbers = #tpu.dot_dimension_numbers<[1], [0], [0], [1], [0, 0, 1, 1], [], []>} : vector<8x4xf32>, vector<4x256xf32>, vector<8x256xf32> -> vector<8x256xf32>
    %21 = vector.extract_strided_slice %15 {offsets = [0, 0], sizes = [1, 256], strides = [1, 1]} : vector<9x256xf32> to vector<1x256xf32>
    %22 = vector.broadcast %21 : vector<1x256xf32> to vector<8x256xf32>
    %23 = arith.mulf %20, %22 : vector<8x256xf32>
    %24 = arith.addf %16, %23 : vector<8x256xf32>
    %25 = vector.extract_strided_slice %13 {offsets = [0, 1], sizes = [4, 256], strides = [1, 1]} : vector<4x290xf32> to vector<4x256xf32>
    %26 = vector.extract_strided_slice %14 {offsets = [1, 0, 0], sizes = [1, 8, 4], strides = [1, 1, 1]} : vector<9x8x4xf32> to vector<1x8x4xf32>
    %27 = vector.shape_cast %26 : vector<1x8x4xf32> to vector<8x4xf32>
    %cst_17 = arith.constant dense<0.000000e+00> : vector<8x256xf32>
    %28 = tpu.matmul %27, %25, %cst_17 {dimension_numbers = #tpu.dot_dimension_numbers<[1], [0], [0], [1], [0, 0, 1, 1], [], []>} : vector<8x4xf32>, vector<4x256xf32>, vector<8x256xf32> -> vector<8x256xf32>
    %29 = vector.extract_strided_slice %15 {offsets = [1, 0], sizes = [1, 256], strides = [1, 1]} : vector<9x256xf32> to vector<1x256xf32>
    %30 = vector.broadcast %29 : vector<1x256xf32> to vector<8x256xf32>
    %31 = arith.mulf %28, %30 : vector<8x256xf32>
    %32 = arith.addf %24, %31 : vector<8x256xf32>
    %33 = vector.extract_strided_slice %13 {offsets = [0, 2], sizes = [4, 256], strides = [1, 1]} : vector<4x290xf32> to vector<4x256xf32>
    %34 = vector.extract_strided_slice %14 {offsets = [2, 0, 0], sizes = [1, 8, 4], strides = [1, 1, 1]} : vector<9x8x4xf32> to vector<1x8x4xf32>
    %35 = vector.shape_cast %34 : vector<1x8x4xf32> to vector<8x4xf32>
    %cst_18 = arith.constant dense<0.000000e+00> : vector<8x256xf32>
    %36 = tpu.matmul %35, %33, %cst_18 {dimension_numbers = #tpu.dot_dimension_numbers<[1], [0], [0], [1], [0, 0, 1, 1], [], []>} : vector<8x4xf32>, vector<4x256xf32>, vector<8x256xf32> -> vector<8x256xf32>
    %37 = vector.extract_strided_slice %15 {offsets = [2, 0], sizes = [1, 256], strides = [1, 1]} : vector<9x256xf32> to vector<1x256xf32>
    %38 = vector.broadcast %37 : vector<1x256xf32> to vector<8x256xf32>
    %39 = arith.mulf %36, %38 : vector<8x256xf32>
    %40 = arith.addf %32, %39 : vector<8x256xf32>
    %41 = vector.extract_strided_slice %13 {offsets = [0, 16], sizes = [4, 256], strides = [1, 1]} : vector<4x290xf32> to vector<4x256xf32>
    %42 = vector.extract_strided_slice %14 {offsets = [3, 0, 0], sizes = [1, 8, 4], strides = [1, 1, 1]} : vector<9x8x4xf32> to vector<1x8x4xf32>
    %43 = vector.shape_cast %42 : vector<1x8x4xf32> to vector<8x4xf32>
    %cst_19 = arith.constant dense<0.000000e+00> : vector<8x256xf32>
    %44 = tpu.matmul %43, %41, %cst_19 {dimension_numbers = #tpu.dot_dimension_numbers<[1], [0], [0], [1], [0, 0, 1, 1], [], []>} : vector<8x4xf32>, vector<4x256xf32>, vector<8x256xf32> -> vector<8x256xf32>
    %45 = vector.extract_strided_slice %15 {offsets = [3, 0], sizes = [1, 256], strides = [1, 1]} : vector<9x256xf32> to vector<1x256xf32>
    %46 = vector.broadcast %45 : vector<1x256xf32> to vector<8x256xf32>
    %47 = arith.mulf %44, %46 : vector<8x256xf32>
    %48 = arith.addf %40, %47 : vector<8x256xf32>
    %49 = vector.extract_strided_slice %13 {offsets = [0, 17], sizes = [4, 256], strides = [1, 1]} : vector<4x290xf32> to vector<4x256xf32>
    %50 = vector.extract_strided_slice %14 {offsets = [4, 0, 0], sizes = [1, 8, 4], strides = [1, 1, 1]} : vector<9x8x4xf32> to vector<1x8x4xf32>
    %51 = vector.shape_cast %50 : vector<1x8x4xf32> to vector<8x4xf32>
    %cst_20 = arith.constant dense<0.000000e+00> : vector<8x256xf32>
    %52 = tpu.matmul %51, %49, %cst_20 {dimension_numbers = #tpu.dot_dimension_numbers<[1], [0], [0], [1], [0, 0, 1, 1], [], []>} : vector<8x4xf32>, vector<4x256xf32>, vector<8x256xf32> -> vector<8x256xf32>
    %53 = vector.extract_strided_slice %15 {offsets = [4, 0], sizes = [1, 256], strides = [1, 1]} : vector<9x256xf32> to vector<1x256xf32>
    %54 = vector.broadcast %53 : vector<1x256xf32> to vector<8x256xf32>
    %55 = arith.mulf %52, %54 : vector<8x256xf32>
    %56 = arith.addf %48, %55 : vector<8x256xf32>
    %57 = vector.extract_strided_slice %13 {offsets = [0, 18], sizes = [4, 256], strides = [1, 1]} : vector<4x290xf32> to vector<4x256xf32>
    %58 = vector.extract_strided_slice %14 {offsets = [5, 0, 0], sizes = [1, 8, 4], strides = [1, 1, 1]} : vector<9x8x4xf32> to vector<1x8x4xf32>
    %59 = vector.shape_cast %58 : vector<1x8x4xf32> to vector<8x4xf32>
    %cst_21 = arith.constant dense<0.000000e+00> : vector<8x256xf32>
    %60 = tpu.matmul %59, %57, %cst_21 {dimension_numbers = #tpu.dot_dimension_numbers<[1], [0], [0], [1], [0, 0, 1, 1], [], []>} : vector<8x4xf32>, vector<4x256xf32>, vector<8x256xf32> -> vector<8x256xf32>
    %61 = vector.extract_strided_slice %15 {offsets = [5, 0], sizes = [1, 256], strides = [1, 1]} : vector<9x256xf32> to vector<1x256xf32>
    %62 = vector.broadcast %61 : vector<1x256xf32> to vector<8x256xf32>
    %63 = arith.mulf %60, %62 : vector<8x256xf32>
    %64 = arith.addf %56, %63 : vector<8x256xf32>
    %65 = vector.extract_strided_slice %13 {offsets = [0, 32], sizes = [4, 256], strides = [1, 1]} : vector<4x290xf32> to vector<4x256xf32>
    %66 = vector.extract_strided_slice %14 {offsets = [6, 0, 0], sizes = [1, 8, 4], strides = [1, 1, 1]} : vector<9x8x4xf32> to vector<1x8x4xf32>
    %67 = vector.shape_cast %66 : vector<1x8x4xf32> to vector<8x4xf32>
    %cst_22 = arith.constant dense<0.000000e+00> : vector<8x256xf32>
    %68 = tpu.matmul %67, %65, %cst_22 {dimension_numbers = #tpu.dot_dimension_numbers<[1], [0], [0], [1], [0, 0, 1, 1], [], []>} : vector<8x4xf32>, vector<4x256xf32>, vector<8x256xf32> -> vector<8x256xf32>
    %69 = vector.extract_strided_slice %15 {offsets = [6, 0], sizes = [1, 256], strides = [1, 1]} : vector<9x256xf32> to vector<1x256xf32>
    %70 = vector.broadcast %69 : vector<1x256xf32> to vector<8x256xf32>
    %71 = arith.mulf %68, %70 : vector<8x256xf32>
    %72 = arith.addf %64, %71 : vector<8x256xf32>
    %73 = vector.extract_strided_slice %13 {offsets = [0, 33], sizes = [4, 256], strides = [1, 1]} : vector<4x290xf32> to vector<4x256xf32>
    %74 = vector.extract_strided_slice %14 {offsets = [7, 0, 0], sizes = [1, 8, 4], strides = [1, 1, 1]} : vector<9x8x4xf32> to vector<1x8x4xf32>
    %75 = vector.shape_cast %74 : vector<1x8x4xf32> to vector<8x4xf32>
    %cst_23 = arith.constant dense<0.000000e+00> : vector<8x256xf32>
    %76 = tpu.matmul %75, %73, %cst_23 {dimension_numbers = #tpu.dot_dimension_numbers<[1], [0], [0], [1], [0, 0, 1, 1], [], []>} : vector<8x4xf32>, vector<4x256xf32>, vector<8x256xf32> -> vector<8x256xf32>
    %77 = vector.extract_strided_slice %15 {offsets = [7, 0], sizes = [1, 256], strides = [1, 1]} : vector<9x256xf32> to vector<1x256xf32>
    %78 = vector.broadcast %77 : vector<1x256xf32> to vector<8x256xf32>
    %79 = arith.mulf %76, %78 : vector<8x256xf32>
    %80 = arith.addf %72, %79 : vector<8x256xf32>
    %81 = vector.extract_strided_slice %13 {offsets = [0, 34], sizes = [4, 256], strides = [1, 1]} : vector<4x290xf32> to vector<4x256xf32>
    %82 = vector.extract_strided_slice %14 {offsets = [8, 0, 0], sizes = [1, 8, 4], strides = [1, 1, 1]} : vector<9x8x4xf32> to vector<1x8x4xf32>
    %83 = vector.shape_cast %82 : vector<1x8x4xf32> to vector<8x4xf32>
    %cst_24 = arith.constant dense<0.000000e+00> : vector<8x256xf32>
    %84 = tpu.matmul %83, %81, %cst_24 {dimension_numbers = #tpu.dot_dimension_numbers<[1], [0], [0], [1], [0, 0, 1, 1], [], []>} : vector<8x4xf32>, vector<4x256xf32>, vector<8x256xf32> -> vector<8x256xf32>
    %85 = vector.extract_strided_slice %15 {offsets = [8, 0], sizes = [1, 256], strides = [1, 1]} : vector<9x256xf32> to vector<1x256xf32>
    %86 = vector.broadcast %85 : vector<1x256xf32> to vector<8x256xf32>
    %87 = arith.mulf %84, %86 : vector<8x256xf32>
    %88 = arith.addf %80, %87 : vector<8x256xf32>
    %c0_25 = arith.constant 0 : index
    %c0_26 = arith.constant 0 : index
    %89 = vector.load %arg6[%c0_25, %c0_26] : memref<8x1xf32, #tpu.memory_space<vmem>>, vector<8x1xf32>
    %90 = vector.broadcast %89 : vector<8x1xf32> to vector<8x256xf32>
    %91 = arith.mulf %88, %90 : vector<8x256xf32>
    %c0_27 = arith.constant 0 : index
    %c0_28 = arith.constant 0 : index
    %92 = vector.load %arg7[%c0_27, %c0_28] : memref<8x1xf32, #tpu.memory_space<vmem>>, vector<8x1xf32>
    %93 = vector.broadcast %92 : vector<8x1xf32> to vector<8x256xf32>
    %94 = arith.addf %91, %93 : vector<8x256xf32>
    %cst_29 = arith.constant 0.000000e+00 : f32
    %95 = vector.broadcast %cst_29 : f32 to vector<8x256xf32>
    %96 = arith.maximumf %94, %95 : vector<8x256xf32>
    %c0_30 = arith.constant 0 : index
    %c0_31 = arith.constant 0 : index
    %c0_32 = arith.constant 0 : index
    %97 = vector.load %arg9[%c0_30, %c0_31, %c0_32] : memref<1x12x256xf32, #tpu.memory_space<vmem>>, vector<1x4x256xf32>
    %98 = vector.shape_cast %97 : vector<1x4x256xf32> to vector<4x256xf32>
    %99 = vector.shape_cast %1 : vector<4x256xf32> to vector<1x4x256xf32>
    tpu.vector_store %arg9[%c0_30, %c0_31, %c0_32], %99 {strides = array<i32>} : memref<1x12x256xf32, #tpu.memory_space<vmem>>, vector<1x4x256xf32>,
    %c0_33 = arith.constant 0 : index
    %c4 = arith.constant 4 : index
    %c0_34 = arith.constant 0 : index
    %100 = vector.load %arg9[%c0_33, %c4, %c0_34] : memref<1x12x256xf32, #tpu.memory_space<vmem>>, vector<1x8x256xf32>
    %101 = vector.shape_cast %100 : vector<1x8x256xf32> to vector<8x256xf32>
    %102 = vector.shape_cast %96 : vector<8x256xf32> to vector<1x8x256xf32>
    tpu.vector_store %arg9[%c0_33, %c4, %c0_34], %102 {strides = array<i32>} : memref<1x12x256xf32, #tpu.memory_space<vmem>>, vector<1x8x256xf32>,
    return
  }
  func.func @transform_0(%arg0: i32) -> (i32, i32, i32) {
    %c0_i32 = arith.constant 0 : i32
    %c0_i32_0 = arith.constant 0 : i32
    %c0_i32_1 = arith.constant 0 : i32
    return %arg0, %c0_i32, %c0_i32_0 : i32, i32, i32
  }
  func.func @transform_1(%arg0: i32) -> (i32, i32) {
    %c0_i32 = arith.constant 0 : i32
    %c0_i32_0 = arith.constant 0 : i32
    %c0_i32_1 = arith.constant 0 : i32
    return %c0_i32, %c0_i32_0 : i32, i32
  }
  func.func @transform_2(%arg0: i32) -> (i32, i32) {
    %c0_i32 = arith.constant 0 : i32
    %c0_i32_0 = arith.constant 0 : i32
    %c0_i32_1 = arith.constant 0 : i32
    return %c0_i32, %c0_i32_0 : i32, i32
  }
  func.func @transform_3(%arg0: i32) -> (i32, i32) {
    %c0_i32 = arith.constant 0 : i32
    %c0_i32_0 = arith.constant 0 : i32
    %c0_i32_1 = arith.constant 0 : i32
    return %c0_i32, %c0_i32_0 : i32, i32
  }
  func.func @transform_4(%arg0: i32) -> (i32, i32, i32) {
    %c0_i32 = arith.constant 0 : i32
    %c0_i32_0 = arith.constant 0 : i32
    %c0_i32_1 = arith.constant 0 : i32
    %c0_i32_2 = arith.constant 0 : i32
    return %c0_i32, %c0_i32_0, %c0_i32_1 : i32, i32, i32
  }
  func.func @transform_5(%arg0: i32) -> (i32, i32) {
    %c0_i32 = arith.constant 0 : i32
    %c0_i32_0 = arith.constant 0 : i32
    %c0_i32_1 = arith.constant 0 : i32
    return %c0_i32, %c0_i32_0 : i32, i32
  }
  func.func @transform_6(%arg0: i32) -> (i32, i32) {
    %c0_i32 = arith.constant 0 : i32
    %c0_i32_0 = arith.constant 0 : i32
    %c0_i32_1 = arith.constant 0 : i32
    return %c0_i32, %c0_i32_0 : i32, i32
  }
  func.func @transform_7(%arg0: i32) -> (i32, i32) {
    %c0_i32 = arith.constant 0 : i32
    %c0_i32_0 = arith.constant 0 : i32
    %c0_i32_1 = arith.constant 0 : i32
    return %c0_i32, %c0_i32_0 : i32, i32
  }
  func.func @transform_8(%arg0: i32) -> (i32, i32, i32) {
    %c0_i32 = arith.constant 0 : i32
    %c0_i32_0 = arith.constant 0 : i32
    %c0_i32_1 = arith.constant 0 : i32
    return %arg0, %c0_i32, %c0_i32_0 : i32, i32, i32
  }
}

</mosaic_0001>

<bundles_post_ra>
// kernel: tpu_custom_call.1
= control target key start
LH: loop header
LB: loop body
LE: loop exit
PB: predicated region body
PF: predicated region fallthrough
CT: control target
= control target key end

     0   :  { %s1534_s27 = smov 0   ;;  %s1667_s0 = inlined_call_operand.vmem [shape: f32[2,4,256], index: 0, kind: input, shape index: {}]   ;;  %s1668_s1 = inlined_call_operand.vmem [shape: f32[4,4], index: 1, kind: input, shape index: {}]   ;;  %s1669_s2 = inlined_call_operand.vmem [shape: f32[4,1], index: 2, kind: input, shape index: {}]   ;;  %s1670_s3 = inlined_call_operand.vmem [shape: f32[4,1], index: 3, kind: input, shape index: {}]   ;;  %s1671_s4 = inlined_call_operand.vmem [shape: f32[9,8,4], index: 4, kind: input, shape index: {}]   ;;  %s1672_s5 = inlined_call_operand.vmem [shape: f32[8,1], index: 5, kind: input, shape index: {}]   ;;  %s1673_s6 = inlined_call_operand.vmem [shape: f32[8,1], index: 6, kind: input, shape index: {}]   ;;  %s1674_s7 = inlined_call_operand.vmem [shape: f32[9,256], index: 7, kind: input, shape index: {}]   ;;  %s1675_s8 = inlined_call_operand.vmem [shape: f32[2,12,256], index: 8, kind: output, shape index: {}]  }
   0x1 LB: > { %s1403_s28 = sadd.s32 4294967295, %s1476_s27   ;;  %p1407_p0 = scmp.ge.s32.totalorder %s1476_s27, 1  ;;  %s1476_s27 = sphi %s1534_s27, %s18_s27  }
   0x2   : > { %p262_p1 = scmp.lt.s32.totalorder %s1476_s27, 3 }
   0x4   : > { %p263_p2 = pnand %p1407_p0, %p262_p1 }
   0x5   : > { %p296_p3 = scmp.lt.s32.totalorder (!%p263_p2), %s1403_s28, 1  ;;  %v1478_v0 = vmov (!%p263_p2), 0.0   ;;  %v390_v1 = vld [vmem:[%s1669_s2] sm:$0xf] (!%p263_p2)  ;;  %v1479_v2 = vmov (!%p263_p2), 0   ;;  %vm314_vm0 = vcmask (!%p263_p2), 1043456  }
   0x6   : > { %266 = sbr.rel (%p263_p2) target bundleno = 743 (0x2e7), region = 52  ;;  %383 = vmatprep.mubr.f32.mxu0 (!%p263_p2), %v1478_v0  ;;  %505 = vmatprep.mubr.f32.mxu1 (!%p263_p2), %v1478_v0  ;;  %v398_v3 = vld [vmem:[%s1670_s3] sm:$0xf] (!%p263_p2)  ;;  %vm310_vm1 = vcmask (!%p263_p2), 31744   ;;  %s1480_s21 = smov (!%p263_p2), 17   ;;  %vm414_vm2 = vcmask (!%p263_p2), 138240  }
   0x7   : > { %1467 = vset.pattern.permute.xlu0 (!%p263_p2), %v1479_v2  ;;  %1468 = vset.pattern.permute.xlu1 (!%p263_p2), %v1479_v2  ;;  %v307_v6 = vld [vmem:[%s1668_s1] sm:$0xf] (!%p263_p2)  ;;  %s1481_s22 = smov (!%p263_p2), 127   ;;  %s1482_s23 = smov (!%p263_p2), 126   ;;  %vm531_vm3 = vcmask (!%p263_p2), 1039360   ;;  %v421_v37 = vld [vmem:[%s1671_s4 + $0x8] sm:$0xff] (!%p263_p2) }
   0x8   : > { %393 = vperm.xlu0 (!%p263_p2), %1467, %v390_v1   ;;  %s1483_s24 = smov (!%p263_p2), 112   ;;  %s1484_s25 = smov (!%p263_p2), 111   ;;  %v420_v21 = vld [vmem:[%s1671_s4] sm:$0xff] (!%p263_p2)  ;;  %vm630_vm4 = vcmask (!%p263_p2), 1031168   ;;  %v422_v41 = vld [vmem:[%s1671_s4 + $0x10] sm:$0xff] (!%p263_p2)  ;;  %vm729_vm5 = vcmask (!%p263_p2), 916480  }
   0x9   : > { %s1485_s26 = smov (!%p263_p2), 110   ;;  %v1317_v23 = vld [vmem:[%s1672_s5] sm:$0xff] (!%p263_p2)  ;;  %v423_v47 = vld [vmem:[%s1671_s4 + $0x18] sm:$0xff] (!%p263_p2)  ;;  %vm828_vm6 = vcmask (!%p263_p2), 908288   ;;  %vm927_vm7 = vcmask (!%p263_p2), 900096   ;;  %v425_v57 = vld [vmem:[%s1671_s4 + $0x28] sm:$0xff] (!%p263_p2) }
   0xa   : > { %v1325_v24 = vld [vmem:[%s1673_s6] sm:$0xff] (!%p263_p2)  ;;  %vm1026_vm8 = vcmask (!%p263_p2), 785408   ;;  %v426_v61 = vld [vmem:[%s1671_s4 + $0x30] sm:$0xff] (!%p263_p2)  ;;  %vm1125_vm9 = vcmask (!%p263_p2), 777216   ;;  %vm1224_vm10 = vcmask (!%p263_p2), 769024  }
   0xb   : > { %v424_v51 = vld [vmem:[%s1671_s4 + $0x20] sm:$0xff] (!%p263_p2) }
   0xc   : > { %401 = vperm.xlu0 (!%p263_p2), %1467, %v398_v3  }
   0xd   : > { %s1677_s28 = smov (!%p296_p3, %s1403_s28), 1 }
   0xe   : > { %s1446_s9 = sshll.u32 %s1677_s28, 3  ;;  %s1447_s10 = sshll.u32 %s1677_s28, 5 }
   0xf   : > { %s300_s15 = scalar_lea.vmem %s1667_s0, %s1446_s9  ;;  %s1556_s18 = scalar_lea.vmem %s1675_s8, %s1447_s10 }
  0x10   : > { %v306_v4 = vld [vmem:[%s300_s15] sm:$0xff]  ;;  %s1486_s28 = smov 96   ;;  %s1487_s9 = smov 95  }
  0x11   : > { %v309_v5 = vcombine.high %v306_v4, %v306_v4  ;;  %1336 = vst [vmem:[%s1556_s18] sm:$0xf] %v306_v4  ;;  %s1488_s10 = smov 94  }
  0x13   : > { %1412 = vmatprep.subr.msk.mxu0 %vm314_vm0, %v309_v5  ;;  %1337 = vst [vmem:[%s1556_s18 + $0x8] sm:$0xf] %v309_v5 }
  0x14   : > { %1413 = vmatpush1.msk.msra.mxu0 %vm314_vm0, %v306_v4  ;;  %v427_v4 = vld [vmem:[%s1671_s4 + $0x38] sm:$0xff] }
  0x15   : > { %1414 = vmatmul.mubr.msk.f32.vlgmr.msra.gmra.mrb[0].mxu0 %vm310_vm1, %v307_v6 }
  0x16   : > { %605 = vmatprep.mubr.f32.mxu0 %v1478_v0 }
  0x87   : > { %v394_v7 = vpop.permute.xlu0 %393 }
  0x8b   : > { %v402_v11 = vpop.permute.xlu0 %401 }
  0xe8   : > { %v385_v8 = vpop.f32.mrb[0].mxu0 }
  0xe9   : > { %v396_v9 = vmul.f32 %v394_v7, %v385_v8  ;;  %v387_v10 = vpop.f32.mrb[1].mxu0 }
  0xea   : > { %v397_v12 = vmul.f32 %v394_v7, %v387_v10 }
  0xeb   : > { %v404_v13 = vadd.f32 %v402_v11, %v396_v9  ;;  %v428_v9 = vld [vmem:[%s1671_s4 + $0x40] sm:$0xff] }
  0xec   : > { %v405_v14 = vadd.f32 %v402_v11, %v397_v12  ;;  %v512_v11 = vlaneseq }
  0xed   : > { %v406_v15 = vmax.f32 %v404_v13, 0.0 }
  0xee   : > { %v407_v16 = vmax.f32 %v405_v14, 0.0  ;;  %v1640_v12 = vshrl.u32 %v512_v11, 7  ;;  %v429_v14 = vld [vmem:[%s1674_s7] sm:$0xff] }
  0xef   : > { %410 = vrot.lane.b32.xlu1 %v406_v15, %s1480_s21 }
  0xf0   : > { %v514_v13 = vsub.s32 0, %v1640_v12  ;;  %v614_v15 = vsub.s32 1, %v1640_v12 }
  0xf3   : > { %412 = vrot.lane.b32.xlu1 %v407_v16, %s1480_s21  ;;  %v430_v16 = vld [vmem:[%s1674_s7 + $0x8] sm:$0xff] }
 0x161   : > { %v411_v17 = vpop.permute.xlu1 %410 }
 0x162   : > { %v418_v18 = vsel %vm414_vm2, 0.0, %v411_v17 }
 0x163   : > { %525 = vrot.lane.b32.xlu0 %v418_v18, %s1481_s22  ;;  %624 = vrot.lane.b32.xlu1 %v418_v18, %s1482_s23 }
 0x165   : > { %v413_v19 = vpop.permute.xlu1 %412 }
 0x166   : > { %v415_v20 = vsel %vm414_vm2, %v411_v17, %v413_v19  ;;  %v419_v22 = vsel %vm414_vm2, %v413_v19, 0.0  ;;  %v515_v17 = vrot.slane %v429_v14, %v514_v13  ;;  %v615_v19 = vrot.slane %v429_v14, %v614_v15 }
 0x167   : > { %723 = vrot.lane.b32.xlu0 %v418_v18, %s1483_s24  ;;  %822 = vrot.lane.b32.xlu1 %v418_v18, %s1484_s25 }
 0x168   : > { %1415 = vmatprep.subr.msk.mxu1 %vm314_vm0, %v415_v20 }
 0x169   : > { %1416 = vmatpush1.msk.msra.mxu1 %vm314_vm0, %v418_v18 }
 0x16a   : > { %1417 = vmatmul.mubr.msk.f32.vlgmr.msra.gmra.mrb[0].mxu1 %vm310_vm1, %v420_v21  ;;  %v619_v21 = vrot.slane %v430_v16, %v614_v15 }
 0x16b   : > { %921 = vrot.lane.b32.xlu0 %v418_v18, %s1485_s26  ;;  %1020 = vrot.lane.b32.xlu1 %v418_v18, %s1486_s28 }
 0x16c   : > { %704 = vmatprep.mubr.f32.mxu1 %v1478_v0 }
 0x16f   : > { %1119 = vrot.lane.b32.xlu0 %v418_v18, %s1487_s9  ;;  %529 = vrot.lane.b32.xlu1 %v419_v22, %s1481_s22 }
 0x173   : > { %626 = vrot.lane.b32.xlu1 %v415_v20, %s1482_s23  ;;  %527 = vrot.lane.b32.xlu0 %v415_v20, %s1481_s22 }
 0x177   : > { %727 = vrot.lane.b32.xlu1 %v419_v22, %s1483_s24  ;;  %628 = vrot.lane.b32.xlu0 %v419_v22, %s1482_s23 }
 0x17b   : > { %824 = vrot.lane.b32.xlu1 %v415_v20, %s1484_s25  ;;  %725 = vrot.lane.b32.xlu0 %v415_v20, %s1483_s24 }
 0x17f   : > { %925 = vrot.lane.b32.xlu1 %v419_v22, %s1485_s26  ;;  %826 = vrot.lane.b32.xlu0 %v419_v22, %s1484_s25 }
 0x183   : > { %1022 = vrot.lane.b32.xlu1 %v415_v20, %s1486_s28  ;;  %923 = vrot.lane.b32.xlu0 %v415_v20, %s1485_s26 }
 0x187   : > { %1123 = vrot.lane.b32.xlu1 %v419_v22, %s1487_s9  ;;  %1024 = vrot.lane.b32.xlu0 %v419_v22, %s1486_s28 }
 0x18b   : > { %1220 = vrot.lane.b32.xlu1 %v415_v20, %s1488_s10  ;;  %1121 = vrot.lane.b32.xlu0 %v415_v20, %s1487_s9  ;;  %v713_v20 = vsub.s32 2, %v1640_v12 }
 0x18f   : > { %1218 = vrot.lane.b32.xlu1 %v418_v18, %s1488_s10  ;;  %1222 = vrot.lane.b32.xlu0 %v419_v22, %s1488_s10  ;;  %v519_v18 = vrot.slane %v430_v16, %v514_v13 }
 0x193   : > { %1320 = vperm.xlu0 %1467, %v1317_v23   ;;  %1328 = vperm.xlu1 %1468, %v1325_v24  }
 0x1d5   : > { %v526_v25 = vpop.permute.xlu0 %525  ;;  %v625_v26 = vpop.permute.xlu1 %624 }
 0x1d9   : > { %v724_v27 = vpop.permute.xlu0 %723  ;;  %v823_v28 = vpop.permute.xlu1 %822 }
 0x1dd   : > { %v922_v29 = vpop.permute.xlu0 %921  ;;  %v1021_v30 = vpop.permute.xlu1 %1020 }
 0x1e1   : > { %v1583_v31 = vpop.permute.xlu0 %1119  ;;  %v530_v32 = vpop.permute.xlu1 %529 }
 0x1e5   : > { %v528_v33 = vpop.permute.xlu0 %527  ;;  %v627_v34 = vpop.permute.xlu1 %626 }
 0x1e6   : > { %v532_v35 = vsel %vm531_vm3, %v526_v25, %v528_v33  ;;  %v533_v36 = vsel %vm531_vm3, %v528_v33, %v530_v32  ;;  %v631_v42 = vsel %vm630_vm4, %v625_v26, %v627_v34 }
 0x1e7   : > { %1418 = vmatprep.subr.msk.mxu0 %vm314_vm0, %v533_v36 }
 0x1e8   : > { %1419 = vmatpush1.msk.msra.mxu0 %vm314_vm0, %v532_v35 }
 0x1e9   : > { %v629_v38 = vpop.permute.xlu0 %628  ;;  %v728_v39 = vpop.permute.xlu1 %727  ;;  %1420 = vmatmul.mubr.msk.f32.vlgmr.msra.gmra.mrb[2].mxu0 %vm310_vm1, %v421_v37  ;;  %v911_v37 = vsub.s32 4, %v1640_v12 }
 0x1ea   : > { %v632_v40 = vsel %vm630_vm4, %v627_v34, %v629_v38  ;;  %803 = vmatprep.mubr.f32.mxu0 %v1478_v0 }
 0x1eb   : > { %1421 = vmatprep.subr.msk.mxu1 %vm314_vm0, %v632_v40 }
 0x1ec   : > { %1422 = vmatpush1.msk.msra.mxu1 %vm314_vm0, %v631_v42 }
 0x1ed   : > { %v726_v43 = vpop.permute.xlu0 %725  ;;  %v825_v44 = vpop.permute.xlu1 %824  ;;  %1423 = vmatmul.mubr.msk.f32.vlgmr.msra.gmra.mrb[2].mxu1 %vm310_vm1, %v422_v41 }
 0x1ee   : > { %v730_v45 = vsel %vm729_vm5, %v724_v27, %v726_v43  ;;  %v731_v46 = vsel %vm729_vm5, %v726_v43, %v728_v39  ;;  %902 = vmatprep.mubr.f32.mxu1 %v1478_v0  ;;  %v829_v52 = vsel %vm828_vm6, %v823_v28, %v825_v44  ;;  %v714_v27 = vrot.slane %v429_v14, %v713_v20 }
 0x1ef   : > { %1424 = vmatprep.subr.msk.mxu0 %vm314_vm0, %v731_v46  ;;  %v812_v28 = vsub.s32 3, %v1640_v12  ;;  %v1010_v46 = vsub.s32 5, %v1640_v12 }
 0x1f0   : > { %1425 = vmatpush1.msk.msra.mxu0 %vm314_vm0, %v730_v45  ;;  %v912_v45 = vrot.slane %v429_v14, %v911_v37 }
 0x1f1   : > { %v827_v48 = vpop.permute.xlu0 %826  ;;  %v926_v49 = vpop.permute.xlu1 %925  ;;  %1426 = vmatmul.mubr.msk.f32.vlgmr.msra.gmra.mrb[4].mxu0 %vm310_vm1, %v423_v47  ;;  %v813_v36 = vrot.slane %v429_v14, %v812_v28  ;;  %v817_v39 = vrot.slane %v430_v16, %v812_v28 }
 0x1f2   : > { %v830_v50 = vsel %vm828_vm6, %v825_v44, %v827_v48  ;;  %1001 = vmatprep.mubr.f32.mxu0 %v1478_v0  ;;  %v916_v48 = vrot.slane %v430_v16, %v911_v37 }
 0x1f3   : > { %1427 = vmatprep.subr.msk.mxu1 %vm314_vm0, %v830_v50 }
 0x1f4   : > { %1428 = vmatpush1.msk.msra.mxu1 %vm314_vm0, %v829_v52 }
 0x1f5   : > { %v924_v53 = vpop.permute.xlu0 %923  ;;  %v1023_v54 = vpop.permute.xlu1 %1022  ;;  %1429 = vmatmul.mubr.msk.f32.vlgmr.msra.gmra.mrb[4].mxu1 %vm310_vm1, %v424_v51 }
 0x1f6   : > { %v928_v55 = vsel %vm927_vm7, %v922_v29, %v924_v53  ;;  %v929_v56 = vsel %vm927_vm7, %v924_v53, %v926_v49  ;;  %1100 = vmatprep.mubr.f32.mxu1 %v1478_v0  ;;  %v1027_v62 = vsel %vm1026_vm8, %v1021_v30, %v1023_v54  ;;  %v718_v30 = vrot.slane %v430_v16, %v713_v20 }
 0x1f7   : > { %1430 = vmatprep.subr.msk.mxu0 %vm314_vm0, %v929_v56 }
 0x1f8   : > { %1431 = vmatpush1.msk.msra.mxu0 %vm314_vm0, %v928_v55  ;;  %v1109_v55 = vsub.s32 6, %v1640_v12 }
 0x1f9   : > { %v1025_v58 = vpop.permute.xlu0 %1024  ;;  %v1124_v59 = vpop.permute.xlu1 %1123  ;;  %1432 = vmatmul.mubr.msk.f32.vlgmr.msra.gmra.mrb[6].mxu0 %vm310_vm1, %v425_v57  ;;  %v1015_v57 = vrot.slane %v430_v16, %v1010_v46 }
 0x1fa   : > { %v1028_v60 = vsel %vm1026_vm8, %v1023_v54, %v1025_v58  ;;  %1199 = vmatprep.mubr.f32.mxu0 %v1478_v0  ;;  %v1011_v54 = vrot.slane %v429_v14, %v1010_v46 }
 0x1fb   : > { %1433 = vmatprep.subr.msk.mxu1 %vm314_vm0, %v1028_v60 }
 0x1fc   : > { %1434 = vmatpush1.msk.msra.mxu1 %vm314_vm0, %v1027_v62 }
 0x1fd   : > { %v1122_v63 = vpop.permute.xlu0 %1121  ;;  %v1221_v1 = vpop.permute.xlu1 %1220  ;;  %1435 = vmatmul.mubr.msk.f32.vlgmr.msra.gmra.mrb[6].mxu1 %vm310_vm1, %v426_v61 }
 0x1fe   : > { %v1126_v2 = vsel %vm1125_vm9, %v1583_v31, %v1122_v63  ;;  %v1127_v3 = vsel %vm1125_vm9, %v1122_v63, %v1124_v59  ;;  %1298 = vmatprep.mubr.f32.mxu1 %v1478_v0  ;;  %v1110_v63 = vrot.slane %v429_v14, %v1109_v55 }
 0x1ff   : > { %1436 = vmatprep.subr.msk.mxu0 %vm314_vm0, %v1127_v3  ;;  %v1114_v3 = vrot.slane %v430_v16, %v1109_v55 }
 0x200   : > { %1437 = vmatpush1.msk.msra.mxu0 %vm314_vm0, %v1126_v2 }
 0x201   : > { %v1223_v5 = vpop.permute.xlu0 %1222  ;;  %v1219_v6 = vpop.permute.xlu1 %1218  ;;  %1438 = vmatmul.mubr.msk.f32.vlgmr.msra.gmra.mrb[8].mxu0 %vm310_vm1, %v427_v4 }
 0x202   : > { %v1226_v7 = vsel %vm1224_vm10, %v1221_v1, %v1223_v5  ;;  %v1225_v8 = vsel %vm1224_vm10, %v1219_v6, %v1221_v1  ;;  %v1208_v1 = vsub.s32 7, %v1640_v12  ;;  %v1442_v12 = vld [vmem:[%s1674_s7 + $0x10] ss:$0 sm:$0xff] }
 0x203   : > { %1439 = vmatprep.subr.msk.mxu1 %vm314_vm0, %v1226_v7 }
 0x204   : > { %1440 = vmatpush1.msk.msra.mxu1 %vm314_vm0, %v1225_v8 }
 0x205   : > { %1441 = vmatmul.mubr.msk.f32.vlgmr.msra.gmra.mrb[8].mxu1 %vm310_vm1, %v428_v9  ;;  %v1209_v9 = vrot.slane %v429_v14, %v1208_v1 }
 0x212   : > { %v1329_v28 = vpop.permute.xlu1 %1328 }
 0x23d   : > { %v507_v0 = vpop.f32.mrb[0].mxu1 }
 0x23e   : > { %v509_v10 = vpop.f32.mrb[1].mxu1  ;;  %v520_v22 = vmul.f32 %v515_v17, %v507_v0 }
 0x23f   : > { %v521_v24 = vmul.f32 %v519_v18, %v509_v10  ;;  %v1213_v10 = vrot.slane %v430_v16, %v1208_v1 }
 0x2bc   : > { %v607_v23 = vpop.f32.mrb[2].mxu0 }
 0x2bd   : > { %v620_v25 = vmul.f32 %v615_v19, %v607_v23  ;;  %v609_v26 = vpop.f32.mrb[3].mxu0 }
 0x2be   : > { %v621_v29 = vmul.f32 %v619_v21, %v609_v26  ;;  %v1443_v21 = vld [vmem:[%s1674_s7 + $0x18] ss:$0 sm:$0xff]  ;;  %v1321_v26 = vpop.permute.xlu0 %1320 }
 0x2bf   : > { %v622_v31 = vadd.f32 %v620_v25, %v520_v22 }
 0x2c0   : > { %v623_v32 = vadd.f32 %v621_v29, %v521_v24  ;;  %v706_v33 = vpop.f32.mrb[2].mxu1 }
 0x2c1   : > { %v719_v34 = vmul.f32 %v714_v27, %v706_v33  ;;  %v708_v35 = vpop.f32.mrb[3].mxu1 }
 0x2c2   : > { %v720_v38 = vmul.f32 %v718_v30, %v708_v35 }
 0x2c3   : > { %v721_v40 = vadd.f32 %v719_v34, %v622_v31 }
 0x2c4   : > { %v722_v41 = vadd.f32 %v720_v38, %v623_v32  ;;  %v805_v42 = vpop.f32.mrb[4].mxu0 }
 0x2c5   : > { %v818_v43 = vmul.f32 %v813_v36, %v805_v42  ;;  %v807_v44 = vpop.f32.mrb[5].mxu0 }
 0x2c6   : > { %v819_v47 = vmul.f32 %v817_v39, %v807_v44 }
 0x2c7   : > { %v820_v49 = vadd.f32 %v818_v43, %v721_v40 }
 0x2c8   : > { %v821_v50 = vadd.f32 %v819_v47, %v722_v41  ;;  %v904_v51 = vpop.f32.mrb[4].mxu1 }
 0x2c9   : > { %v917_v52 = vmul.f32 %v912_v45, %v904_v51  ;;  %v906_v53 = vpop.f32.mrb[5].mxu1 }
 0x2ca   : > { %v918_v56 = vmul.f32 %v916_v48, %v906_v53 }
 0x2cb   : > { %v919_v58 = vadd.f32 %v917_v52, %v820_v49 }
 0x2cc   : > { %v920_v59 = vadd.f32 %v918_v56, %v821_v50  ;;  %v1003_v60 = vpop.f32.mrb[6].mxu0 }
 0x2cd   : > { %v1016_v61 = vmul.f32 %v1011_v54, %v1003_v60  ;;  %v1005_v62 = vpop.f32.mrb[7].mxu0 }
 0x2ce   : > { %v1017_v2 = vmul.f32 %v1015_v57, %v1005_v62 }
 0x2cf   : > { %v1018_v4 = vadd.f32 %v1016_v61, %v919_v58 }
 0x2d0   : > { %v1019_v5 = vadd.f32 %v1017_v2, %v920_v59  ;;  %v1102_v6 = vpop.f32.mrb[6].mxu1 }
 0x2d1   : > { %v1115_v7 = vmul.f32 %v1110_v63, %v1102_v6  ;;  %v1104_v8 = vpop.f32.mrb[7].mxu1 }
 0x2d2   : > { %v1116_v0 = vmul.f32 %v1114_v3, %v1104_v8 }
 0x2d3   : > { %v1117_v11 = vadd.f32 %v1115_v7, %v1018_v4 }
 0x2d4   : > { %v1118_v13 = vadd.f32 %v1116_v0, %v1019_v5  ;;  %v1201_v15 = vpop.f32.mrb[8].mxu0 }
 0x2d5   : > { %v1214_v17 = vmul.f32 %v1209_v9, %v1201_v15  ;;  %v1203_v18 = vpop.f32.mrb[9].mxu0 }
 0x2d6   : > { %v1215_v19 = vmul.f32 %v1213_v10, %v1203_v18 }
 0x2d7   : > { %v1216_v20 = vadd.f32 %v1214_v17, %v1117_v11 }
 0x2d8   : > { %v1217_v22 = vadd.f32 %v1215_v19, %v1118_v13  ;;  %v1300_v23 = vpop.f32.mrb[8].mxu1 }
 0x2d9   : > { %v1313_v14 = vmul.f32 %v1442_v12, %v1300_v23  ;;  %v1302_v16 = vpop.f32.mrb[9].mxu1 }
 0x2da   : > { %v1314_v24 = vmul.f32 %v1443_v21, %v1302_v16 }
 0x2db   : > { %v1315_v25 = vadd.f32 %v1313_v14, %v1216_v20 }
 0x2dc   : > { %v1316_v27 = vadd.f32 %v1314_v24, %v1217_v22 }
 0x2dd   : > { %v1323_v29 = vmul.f32 %v1321_v26, %v1315_v25 }
 0x2de   : > { %v1324_v30 = vmul.f32 %v1321_v26, %v1316_v27 }
 0x2df   : > { %v1331_v31 = vadd.f32 %v1329_v28, %v1323_v29 }
 0x2e0   : > { %v1332_v32 = vadd.f32 %v1329_v28, %v1324_v30 }
 0x2e1   : > { %v1333_v33 = vmax.f32 %v1331_v31, 0.0 }
 0x2e2   : > { %v1334_v34 = vmax.f32 %v1332_v32, 0.0 }
 0x2e3   : > { %v1340_v35 = vrot.slane %v1333_v33, 4 }
 0x2e4   : > { %v1341_v36 = vrot.slane %v1334_v34, 4 }
 0x2e5   : > { %1344 = vst [vmem:[%s1556_s18 + $0x10] ss:$-12 sps:$4 sm:$0xff] %v1340_v35  }
 0x2e6   : > { %1345 = vst [vmem:[%s1556_s18 + $0x18] ss:$-12 sps:$4 sm:$0xff] %v1341_v36  }
 0x2e7 PF: > { %s18_s27 = sadd.s32 1, %s1476_s27  }
 0x2e8   : > { %p15_p4 = scmp.ge.s32.totalorder %s18_s27, 4  }
 0x2ea   :  { %17 = sbr.rel (!%p15_p4) target bundleno = 1 (0x1), region = 82 }

</bundles_post_ra>
